<compile_context>
chip_gen: v5e
topology: v5e:2x2
jax: 0.10.0
libtpu: 0.0.40
codegen_flags: <defaults>
</compile_context>

<pallas_src>
import math

import jax
import jax.numpy as jnp
from jax import lax
from jax.experimental import pallas as pl
from jax.experimental.pallas import tpu as pltpu

_SQRT_HALF = 1.0 / math.sqrt(2.0)


# ---------------------------------------------------------------------------
# Helpers
# ---------------------------------------------------------------------------

def _round_up(x, m):
    return (x + m - 1) // m * m


def _pick_tile(dim, base, max_tile):
    """Largest multiple of `base` <= max_tile that divides round_up(dim, base).

    Keeps tiles (8,128)-aligned while avoiding padded-FLOP blowup for
    non-power-of-two dims (e.g. 768 stays 768 instead of padding to 1024).
    """
    rounded = _round_up(dim, base)
    cap = min(max_tile, rounded)
    cap = (cap // base) * base
    for t in range(cap, base - 1, -base):
        if rounded % t == 0:
            return t
    return base


def _vmem_budget_bytes():
    """Scoped-VMEM budget with headroom per chip generation.

    v7x has 64 MiB physical -> ~40 MiB budget; v5e/v6e have 128 MiB -> 96 MiB.
    """
    phys = 64 << 20  # conservative fallback (v7x)
    try:
        phys = int(pltpu.get_tpu_info().vmem_capacity_bytes)
    except Exception:
        pass
    return min(max(phys - (24 << 20), 32 << 20), 96 << 20)


def _tile_footprint(tm, tn, tk, in_bytes, out_bytes, needs_scratch):
    """Approximate double-buffered VMEM footprint of one grid step."""
    fp = 2 * tm * tk * in_bytes          # x tile, double-buffered
    fp += 2 * tk * tn * in_bytes         # W^T tile, double-buffered
    fp += 2 * tm * tn * out_bytes        # out tile, double-buffered
    fp += 2 * tn * 4                     # bias tile (f32)
    if needs_scratch:
        fp += tm * tn * 4                # f32 accumulator scratch
    return fp


def _gelu_f32(y, approximate):
    if approximate:
        # tanh-approx GELU lowers through the EUP slot (bf16-capable on
        # v6e/v7x) — nearly free when VALU/MXU slots are the binding resource.
        return jax.nn.gelu(y, approximate=True)
    # Exact erf GELU, matching the PyTorch/BERT reference.
    return 0.5 * y * (1.0 + lax.erf(y * _SQRT_HALF))


# ---------------------------------------------------------------------------
# Kernels
# ---------------------------------------------------------------------------

def _make_direct_kernel(approximate):
    """f32 output: accumulate straight into the resident o_ref block.

    The out BlockSpec index_map ignores k, so o_ref lives in VMEM across the
    whole K reduction — no separate f32 scratch and no epilogue copy.
    """
    def kernel(x_ref, w_ref, b_ref, o_ref):
        # x_ref: (tm, tk)   w_ref: (tk, tn) [pre-transposed W]   b_ref: (1, tn)
        k = pl.program_id(2)
        prod = jnp.dot(x_ref[...], w_ref[...],
                       preferred_element_type=jnp.float32)

        @pl.when(k == 0)
        def _():
            o_ref[...] = prod            # first-k write: no zero-init pass

        @pl.when(k != 0)
        def _():
            o_ref[...] += prod

        @pl.when(k == pl.num_programs(2) - 1)
        def _():
            y = o_ref[...] + b_ref[...]
            o_ref[...] = _gelu_f32(y, approximate).astype(o_ref.dtype)

    return kernel


def _make_scratch_kernel(approximate):
    """Sub-f32 output: keep an f32 VMEM accumulator, cast only in the epilogue."""
    def kernel(x_ref, w_ref, b_ref, o_ref, acc_ref):
        k = pl.program_id(2)
        prod = jnp.dot(x_ref[...], w_ref[...],
                       preferred_element_type=jnp.float32)

        @pl.when(k == 0)
        def _():
            acc_ref[...] = prod          # first-k write: no zero-init pass

        @pl.when(k != 0)
        def _():
            acc_ref[...] += prod

        @pl.when(k == pl.num_programs(2) - 1)
        def _():
            y = acc_ref[...] + b_ref[...]
            o_ref[...] = _gelu_f32(y, approximate).astype(o_ref.dtype)

    return kernel


# ---------------------------------------------------------------------------
# Wrapper
# ---------------------------------------------------------------------------

def prepare_linear_params(weight, bias, *, compute_dtype=jnp.bfloat16,
                          max_tn=1024, max_tk=1024):
    """One-time transform of PyTorch-layout params for the kernel.

    weight: (out_features, in_features)   bias: (out_features,)
    Transposes W to canonical (K, N) MXU-RHS layout, pads to tile multiples
    and casts to `compute_dtype`. Reuse the result across calls so the full
    weight is not re-padded/re-transposed every forward.
    """
    N, K = weight.shape
    tn = _pick_tile(N, 128, max_tn)
    tk = _pick_tile(K, 128, max_tk)
    N_pad, K_pad = _round_up(N, tn), _round_up(K, tk)

    w = weight.astype(compute_dtype).T          # (K, N): no per-tile transpose
    if (K_pad, N_pad) != (K, N):
        w = jnp.pad(w, ((0, K_pad - K), (0, N_pad - N)))

    b = bias.astype(jnp.float32).reshape(1, N)  # bias stays f32 (epilogue add)
    if N_pad != N:
        b = jnp.pad(b, ((0, 0), (0, N_pad - N)))

    return dict(w=w, b=b, tn=tn, tk=tk, N=N, K=K, N_pad=N_pad, K_pad=K_pad,
                compute_dtype=compute_dtype)


def linear_with_act(hidden_states, weight=None, bias=None, dropout_prob=0.0,
                    act_name="gelu", *, params=None,
                    compute_dtype=jnp.bfloat16, approximate_gelu=False,
                    max_tm=512, max_tn=1024, max_tk=1024, buffer_count=None):
    """y = gelu(x @ W^T + b).

    hidden_states: (..., in_features)
    weight: (out_features, in_features) [PyTorch layout], bias: (out_features,)
    (or pass `params=prepare_linear_params(weight, bias, ...)` to amortize the
    one-time weight transpose/pad/cast across calls).
    Output dtype == hidden_states.dtype; matmul runs in `compute_dtype` on the
    MXU with f32 accumulation.
    """
    # TODO(synk): training-mode dropout (dropout_prob > 0) is not implemented
    # (module default is 0.0 / eval => identity).
    assert dropout_prob == 0.0
    assert act_name == "gelu"

    if params is None:
        assert weight is not None and bias is not None
        params = prepare_linear_params(weight, bias, compute_dtype=compute_dtype,
                                       max_tn=max_tn, max_tk=max_tk)
    compute_dtype = params["compute_dtype"]

    lead = hidden_states.shape[:-1]
    K = hidden_states.shape[-1]
    assert K == params["K"]
    N = params["N"]
    tn, tk = params["tn"], params["tk"]
    N_pad, K_pad = params["N_pad"], params["K_pad"]
    out_dtype = hidden_states.dtype

    M = 1
    for d in lead:
        M *= d

    in_bytes = jnp.dtype(compute_dtype).itemsize
    out_bytes = jnp.dtype(out_dtype).itemsize
    needs_scratch = out_dtype != jnp.float32

    # Pick tm: as big as possible (fewer grid steps, less W re-streaming)
    # while the double-buffered footprint fits the per-generation VMEM budget.
    budget = _vmem_budget_bytes()
    tm = max(8, (min(max_tm, _round_up(M, 8)) // 8) * 8)
    while (tm > 8 and
           _tile_footprint(tm, tn, tk, in_bytes, out_bytes, needs_scratch)
           > int(budget * 0.85)):
        tm = max(8, ((tm // 2) // 8) * 8)
    M_pad = _round_up(M, tm)

    x2d = hidden_states.reshape(M, K).astype(compute_dtype)
    if (M_pad, K_pad) != (M, K):
        x2d = jnp.pad(x2d, ((0, M_pad - M), (0, K_pad - K)))

    grid = (M_pad // tm, N_pad // tn, K_pad // tk)

    # Optional deeper buffering for the streamed operands (v5e: if the trace
    # shows exposed DMA waits with bf16 inputs, pass buffer_count=3).
    stream_kwargs = {}
    if buffer_count is not None:
        stream_kwargs["pipeline_mode"] = pl.Buffered(buffer_count)

    kernel = (_make_scratch_kernel(approximate_gelu) if needs_scratch
              else _make_direct_kernel(approximate_gelu))
    scratch_shapes = ([pltpu.VMEM((tm, tn), jnp.float32)]
                      if needs_scratch else [])

    out = pl.pallas_call(
        kernel,
        out_shape=jax.ShapeDtypeStruct((M_pad, N_pad), out_dtype),
        grid_spec=pltpu.PrefetchScalarGridSpec(
            num_scalar_prefetch=0,
            grid=grid,
            in_specs=[
                pl.BlockSpec((tm, tk), lambda i, j, k: (i, k),
                             **stream_kwargs),                  # x
                pl.BlockSpec((tk, tn), lambda i, j, k: (k, j),
                             **stream_kwargs),                  # W^T (K, N)
                pl.BlockSpec((1, tn), lambda i, j, k: (0, j)),  # bias
            ],
            out_specs=pl.BlockSpec((tm, tn), lambda i, j, k: (i, j)),
            scratch_shapes=scratch_shapes,
        ),
        compiler_params=pltpu.CompilerParams(
            dimension_semantics=("parallel", "parallel", "arbitrary"),
            vmem_limit_bytes=budget,
        ),
        cost_estimate=pl.CostEstimate(
            flops=2 * M * K * N,
            transcendentals=M * N,
            bytes_accessed=(x2d.size * in_bytes * grid[1]        # x re-streamed per N tile
                            + params["w"].size * in_bytes * grid[0]  # W re-streamed per M tile
                            + params["b"].size * 4 * grid[0]
                            + M_pad * N_pad * out_bytes),
        ),
    )(x2d, params["w"], params["b"])

    return out[:M, :N].reshape(*lead, N)


# TODO(synk): v7x-only fp8 weight path (per-tile scales folded into the
# bias/GELU epilogue) not implemented — requires model-level quantization.


if __name__ == "__main__":
    key = jax.random.PRNGKey(0)
    k_x, k_w, k_b = jax.random.split(key, 3)

    batch, seq, in_features, out_features = 2, 8, 32, 64

    x = jax.random.normal(k_x, (batch, seq, in_features), dtype=jnp.float32)
    # Deterministic "nn.Linear" parameters (PyTorch shapes: W (out,in), b (out,))
    bound = 1.0 / math.sqrt(in_features)
    weight = jax.random.uniform(
        k_w, (out_features, in_features), minval=-bound, maxval=bound,
        dtype=jnp.float32)
    bias = jax.random.uniform(
        k_b, (out_features,), minval=-bound, maxval=bound, dtype=jnp.float32)

    # Plain-JAX reference (exact erf GELU), f32 throughout.
    ref = x @ weight.T + bias
    ref = 0.5 * ref * (1.0 + lax.erf(ref / math.sqrt(2.0)))

    # 1) f32 MXU path — tight numerics check; exercises the no-scratch kernel
    #    that accumulates directly into the resident f32 output block.
    y32 = jax.block_until_ready(
        linear_with_act(x, weight, bias, compute_dtype=jnp.float32))
    assert y32.shape == (batch, seq, out_features)
    assert jnp.allclose(y32, ref, atol=1e-5, rtol=1e-5)

    # 2) Default bf16 MXU path (f32 in/out, bf16 compute with f32 accumulation).
    ybf = jax.block_until_ready(linear_with_act(x, weight, bias))
    assert ybf.dtype == jnp.float32
    assert jnp.allclose(ybf, ref, atol=5e-2, rtol=5e-2)

    # 3) bf16 activations end to end (bf16 output => f32 scratch-accumulator
    #    kernel), with the one-time prepared weight reused.
    params = prepare_linear_params(weight, bias)
    ybf16 = jax.block_until_ready(
        linear_with_act(x.astype(jnp.bfloat16), params=params))
    assert ybf16.dtype == jnp.bfloat16
    assert jnp.allclose(ybf16.astype(jnp.float32), ref, atol=7.5e-2, rtol=7.5e-2)

    print("KERNEL_OK")
</pallas_src>

<mosaic_0001>
module attributes {stable_mosaic.version = 11 : i64} {
  func.func @kernel(%arg0: i32, %arg1: i32, %arg2: i32, %arg3: memref<16x128xf32, #tpu.memory_space<vmem>>, %arg4: memref<128x128xf32, #tpu.memory_space<vmem>>, %arg5: memref<1x128xf32, #tpu.memory_space<vmem>>, %arg6: memref<16x128xf32, #tpu.memory_space<vmem>>) attributes {dimension_semantics = [#tpu.dimension_semantics<parallel>, #tpu.dimension_semantics<parallel>, #tpu.dimension_semantics<arbitrary>], iteration_bounds = array<i64: 1, 1, 1>, scalar_prefetch = 0 : i64, scratch_operands = 0 : i64, tpu.core_type = #tpu.core_type<tc>, window_params = [{transform_indices = @transform_0, window_bounds = array<i64: 16, 128>}, {transform_indices = @transform_1, window_bounds = array<i64: 128, 128>}, {transform_indices = @transform_2, window_bounds = array<i64: 1, 128>}, {transform_indices = @transform_3, window_bounds = array<i64: 16, 128>}]} {
    %c0 = arith.constant 0 : index
    %c0_0 = arith.constant 0 : index
    %0 = vector.load %arg3[%c0, %c0_0] : memref<16x128xf32, #tpu.memory_space<vmem>>, vector<16x128xf32>
    %c0_1 = arith.constant 0 : index
    %c0_2 = arith.constant 0 : index
    %1 = vector.load %arg4[%c0_1, %c0_2] : memref<128x128xf32, #tpu.memory_space<vmem>>, vector<128x128xf32>
    %cst = arith.constant dense<0.000000e+00> : vector<16x128xf32>
    %2 = tpu.matmul %0, %1, %cst {dimension_numbers = #tpu.dot_dimension_numbers<[1], [0], [0], [1], [0, 0, 1, 1], [], []>} : vector<16x128xf32>, vector<128x128xf32>, vector<16x128xf32> -> vector<16x128xf32>
    %c0_i32 = arith.constant 0 : i32
    %3 = arith.cmpi eq, %arg2, %c0_i32 : i32
    %4 = arith.extui %3 : i1 to i32
    %c0_i32_3 = arith.constant 0 : i32
    %5 = arith.cmpi ne, %4, %c0_i32_3 : i32
    scf.if %5 {
      %c0_8 = arith.constant 0 : index
      %c0_9 = arith.constant 0 : index
      %12 = vector.load %arg6[%c0_8, %c0_9] : memref<16x128xf32, #tpu.memory_space<vmem>>, vector<16x128xf32>
      tpu.vector_store %arg6[%c0_8, %c0_9], %2 {strides = array<i32>} : memref<16x128xf32, #tpu.memory_space<vmem>>, vector<16x128xf32>,
    } else {
    }
    %c0_i32_4 = arith.constant 0 : i32
    %6 = arith.cmpi ne, %arg2, %c0_i32_4 : i32
    %7 = arith.extui %6 : i1 to i32
    %c0_i32_5 = arith.constant 0 : i32
    %8 = arith.cmpi ne, %7, %c0_i32_5 : i32
    scf.if %8 {
      %c0_8 = arith.constant 0 : index
      %c0_9 = arith.constant 0 : index
      %12 = vector.load %arg6[%c0_8, %c0_9] : memref<16x128xf32, #tpu.memory_space<vmem>>, vector<16x128xf32>
      %13 = arith.addf %12, %2 : vector<16x128xf32>
      %c0_10 = arith.constant 0 : index
      %c0_11 = arith.constant 0 : index
      %14 = vector.load %arg6[%c0_10, %c0_11] : memref<16x128xf32, #tpu.memory_space<vmem>>, vector<16x128xf32>
      tpu.vector_store %arg6[%c0_10, %c0_11], %13 {strides = array<i32>} : memref<16x128xf32, #tpu.memory_space<vmem>>, vector<16x128xf32>,
    } else {
    }
    %c0_i32_6 = arith.constant 0 : i32
    %9 = arith.cmpi eq, %arg2, %c0_i32_6 : i32
    %10 = arith.extui %9 : i1 to i32
    %c0_i32_7 = arith.constant 0 : i32
    %11 = arith.cmpi ne, %10, %c0_i32_7 : i32
    scf.if %11 {
      %c0_8 = arith.constant 0 : index
      %c0_9 = arith.constant 0 : index
      %12 = vector.load %arg6[%c0_8, %c0_9] : memref<16x128xf32, #tpu.memory_space<vmem>>, vector<16x128xf32>
      %c0_10 = arith.constant 0 : index
      %c0_11 = arith.constant 0 : index
      %13 = vector.load %arg5[%c0_10, %c0_11] : memref<1x128xf32, #tpu.memory_space<vmem>>, vector<1x128xf32>
      %14 = vector.broadcast %13 : vector<1x128xf32> to vector<16x128xf32>
      %15 = arith.addf %12, %14 : vector<16x128xf32>
      %cst_12 = arith.constant 5.000000e-01 : f32
      %16 = vector.broadcast %cst_12 : f32 to vector<16x128xf32>
      %17 = arith.mulf %16, %15 : vector<16x128xf32>
      %cst_13 = arith.constant 0.707106769 : f32
      %18 = vector.broadcast %cst_13 : f32 to vector<16x128xf32>
      %19 = arith.mulf %15, %18 : vector<16x128xf32>
      %20 = math.erf %19 : vector<16x128xf32>
      %cst_14 = arith.constant 1.000000e+00 : f32
      %21 = vector.broadcast %cst_14 : f32 to vector<16x128xf32>
      %22 = arith.addf %21, %20 : vector<16x128xf32>
      %23 = arith.mulf %17, %22 : vector<16x128xf32>
      %c0_15 = arith.constant 0 : index
      %c0_16 = arith.constant 0 : index
      %24 = vector.load %arg6[%c0_15, %c0_16] : memref<16x128xf32, #tpu.memory_space<vmem>>, vector<16x128xf32>
      tpu.vector_store %arg6[%c0_15, %c0_16], %23 {strides = array<i32>} : memref<16x128xf32, #tpu.memory_space<vmem>>, vector<16x128xf32>,
    } else {
    }
    return
  }
  func.func @transform_0(%arg0: i32, %arg1: i32, %arg2: i32) -> (i32, i32) {
    %c0_i32 = arith.constant 0 : i32
    return %arg0, %arg2 : i32, i32
  }
  func.func @transform_1(%arg0: i32, %arg1: i32, %arg2: i32) -> (i32, i32) {
    %c0_i32 = arith.constant 0 : i32
    return %arg2, %arg1 : i32, i32
  }
  func.func @transform_2(%arg0: i32, %arg1: i32, %arg2: i32) -> (i32, i32) {
    %c0_i32 = arith.constant 0 : i32
    %c0_i32_0 = arith.constant 0 : i32
    return %c0_i32, %arg1 : i32, i32
  }
  func.func @transform_3(%arg0: i32, %arg1: i32, %arg2: i32) -> (i32, i32) {
    %c0_i32 = arith.constant 0 : i32
    return %arg0, %arg1 : i32, i32
  }
}

</mosaic_0001>

<bundles_post_ra>
// kernel: tpu_custom_call.1
= control target key start
LH: loop header
LB: loop body
LE: loop exit
PB: predicated region body
PF: predicated region fallthrough
CT: control target
= control target key end

     0   :  { %8 = vsyncpa [#allocation3], 0  ;;  %s395_s0 = inlined_call_operand.hbm [shape: f32[16,128], index: 0, kind: input, shape index: {}]   ;;  %s396_s1 = inlined_call_operand.hbm [shape: f32[128,128], index: 1, kind: input, shape index: {}]   ;;  %s397_s2 = inlined_call_operand.vmem [shape: f32[1,128], index: 2, kind: input, shape index: {}]   ;;  %s398_s3 = inlined_call_operand.hbm [shape: f32[16,128], index: 3, kind: output, shape index: {}]  }
   0x1   :  { %9 = vsyncpa [#allocation6], 0 }
   0x2   :  { %10 = vsyncpa [#allocation4], 0  ;;  %s15_s14 = sshll.u32 %s395_s0, 4  ;;  %s331_s15 = smov [#allocation2]   ;;  %s16_s14 = int_to_ptr.hbm [resolvable:$true] %s15_s14 }
   0x3   :  { %s17_s16 = sshll.u32 %s331_s15, 4  ;;  %s28_s19 = sshll.u32 %s396_s1, 4  ;;  %s18_s16 = int_to_ptr.vmem [resolvable:$true] %s17_s16  ;;  %s29_s19 = int_to_ptr.hbm [resolvable:$true] %s28_s19 }
   0x4   :  { %s332_s20 = smov 128   ;;  %s333_s21 = smov 8  }
   0x5   :  { %23 = dma.hbm_to_vmem [thread:$0]  %s16_s14, 256, %s18_s16, [#allocation3], %s332_s20, %s332_s20, %s333_s21  }
   0x6   :  { %s334_s22 = smov [#allocation5]  }
   0x7   :  { %s30_s23 = sshll.u32 %s334_s22, 4  ;;  %s31_s23 = int_to_ptr.vmem [resolvable:$true] %s30_s23 }
   0x8   :  { %36 = dma.hbm_to_vmem [thread:$0]  %s29_s19, 2048, %s31_s23, [#allocation6], %s332_s20, %s332_s20, %s333_s21  }
   0x9   :  { %325 = dma.done.wait [#allocation3], 256  }
   0xa   :  { %326 = vsyncadd [#allocation3], 4294967040 }
   0xb   :  { %327 = dma.done.wait [#allocation6], 2048  }
   0xc   :  { %328 = vsyncadd [#allocation6], 4294965248  ;;  %v64_v0 = vld [vmem:[#allocation5 + $0x78] sm:$0xff]  ;;  %v63_v1 = vld [vmem:[#allocation5 + $0x70] sm:$0xff]  ;;  %s211_s27 = sshll.u32 %s398_s3, 4  ;;  %s212_s27 = int_to_ptr.hbm [resolvable:$true] %s211_s27 }
   0xd   :  { %65 = vmatpush.msra.mxu0 %v64_v0  ;;  %227 = vmatpush.msra.mxu1 %v64_v0  ;;  %v62_v2 = vld [vmem:[#allocation5 + $0x68] sm:$0xff]  ;;  %v61_v3 = vld [vmem:[#allocation5 + $0x60] sm:$0xff]  ;;  %v60_v4 = vld [vmem:[#allocation5 + $0x58] sm:$0xff] }
   0xe   :  { %v59_v5 = vld [vmem:[#allocation5 + $0x50] sm:$0xff]  ;;  %v58_v6 = vld [vmem:[#allocation5 + $0x48] sm:$0xff]  ;;  %v57_v7 = vld [vmem:[#allocation5 + $0x40] sm:$0xff] }
   0xf   :  { %66 = vmatpush.msra.mxu0 %v63_v1  ;;  %228 = vmatpush.msra.mxu1 %v63_v1  ;;  %v56_v8 = vld [vmem:[#allocation5 + $0x38] sm:$0xff]  ;;  %v55_v9 = vld [vmem:[#allocation5 + $0x30] sm:$0xff]  ;;  %v54_v10 = vld [vmem:[#allocation5 + $0x28] sm:$0xff] }
  0x10   :  { %v53_v11 = vld [vmem:[#allocation5 + $0x20] sm:$0xff]  ;;  %v52_v12 = vld [vmem:[#allocation5 + $0x18] sm:$0xff]  ;;  %v51_v13 = vld [vmem:[#allocation5 + $0x10] sm:$0xff] }
  0x11   :  { %67 = vmatpush.msra.mxu0 %v62_v2  ;;  %229 = vmatpush.msra.mxu1 %v62_v2  ;;  %v50_v14 = vld [vmem:[#allocation5 + $0x8] sm:$0xff]  ;;  %v49_v15 = vld [vmem:[#allocation5] sm:$0xff]  ;;  %v47_v16 = vld [vmem:[#allocation2] sm:$0xff] }
  0x12   :  { %v48_v17 = vld [vmem:[#allocation2 + $0x8] sm:$0xff]  ;;  %v248_v18 = vld [vmem:[%s397_s2] ss:$0 sm:$0xff]  ;;  %s335_s2 = smov [#allocation7]  }
  0x13   :  { %68 = vmatpush.msra.mxu0 %v61_v3  ;;  %230 = vmatpush.msra.mxu1 %v61_v3  ;;  %s209_s24 = sshll.u32 %s335_s2, 4  ;;  %s210_s24 = int_to_ptr.vmem [resolvable:$true] %s209_s24 }
  0x15   :  { %69 = vmatpush.msra.mxu0 %v60_v4  ;;  %231 = vmatpush.msra.mxu1 %v60_v4 }
  0x17   :  { %70 = vmatpush.msra.mxu0 %v59_v5  ;;  %232 = vmatpush.msra.mxu1 %v59_v5 }
  0x19   :  { %71 = vmatpush.msra.mxu0 %v58_v6  ;;  %233 = vmatpush.msra.mxu1 %v58_v6 }
  0x1b   :  { %72 = vmatpush.msra.mxu0 %v57_v7  ;;  %234 = vmatpush.msra.mxu1 %v57_v7 }
  0x1d   :  { %73 = vmatpush.msra.mxu0 %v56_v8  ;;  %235 = vmatpush.msra.mxu1 %v56_v8 }
  0x1f   :  { %74 = vmatpush.msra.mxu0 %v55_v9  ;;  %236 = vmatpush.msra.mxu1 %v55_v9 }
  0x21   :  { %75 = vmatpush.msra.mxu0 %v54_v10  ;;  %237 = vmatpush.msra.mxu1 %v54_v10 }
  0x23   :  { %76 = vmatpush.msra.mxu0 %v53_v11  ;;  %238 = vmatpush.msra.mxu1 %v53_v11 }
  0x25   :  { %77 = vmatpush.msra.mxu0 %v52_v12  ;;  %239 = vmatpush.msra.mxu1 %v52_v12 }
  0x27   :  { %78 = vmatpush.msra.mxu0 %v51_v13  ;;  %240 = vmatpush.msra.mxu1 %v51_v13 }
  0x29   :  { %79 = vmatpush.msra.mxu0 %v50_v14  ;;  %241 = vmatpush.msra.mxu1 %v50_v14 }
  0x2b   :  { %80 = vmatpush.msra.mxu0 %v49_v15  ;;  %242 = vmatpush.msra.mxu1 %v49_v15 }
  0x2c   :  { %81 = vmatmul.f32.vlgmr.msra.gmra.mxu0 %v47_v16  ;;  %84 = vmatmul.f32.vlgmr.msra.gmra.mxu1 %v48_v17 }
  0xa9   :  { %v82_v19 = vpop.f32.mrf.mxu0  ;;  %v85_v20 = vpop.f32.mrf.mxu1 }
  0xaa   :  { %v371_v21 = vadd.f32 %v248_v18, %v82_v19  ;;  %v373_v22 = vadd.f32 %v248_v18, %v85_v20 }
  0xac   :  { %v376_v23 = vmul.f32 0.70710677, %v371_v21  ;;  %v379_v24 = vmul.f32 0.70710677, %v373_v22 }
  0xae   :  { %v119_v25 = vmul.f32 %v376_v23, %v376_v23  ;;  %v159_v26 = vmul.f32 %v379_v24, %v379_v24 }
  0xb0   :  { %v120_v27 = vmin.f32 %v119_v25, 16.0  ;;  %v160_v28 = vmin.f32 %v159_v26, 16.0 }
  0xb2   :  { %v121_v29 = vmul.f32 2.1237322e-06, %v120_v27  ;;  %v132_v30 = vmul.f32 3.8918573e-05, %v120_v27  ;;  %v161_v31 = vmul.f32 2.1237322e-06, %v160_v28 }
  0xb3   :  { %v172_v32 = vmul.f32 3.8918573e-05, %v160_v28 }
  0xb4   :  { %v122_v33 = vadd.f32 0.00028619796, %v121_v29  ;;  %v133_v34 = vadd.f32 0.001143296, %v132_v30  ;;  %v162_v35 = vadd.f32 0.00028619796, %v161_v31 }
  0xb5   :  { %v173_v36 = vadd.f32 0.001143296, %v172_v32 }
  0xb6   :  { %v123_v37 = vmul.f32 %v122_v33, %v120_v27  ;;  %v134_v38 = vmul.f32 %v133_v34, %v120_v27  ;;  %v163_v39 = vmul.f32 %v162_v35, %v160_v28  ;;  %v115_v35 = vmul.f32 0.5, %v371_v21 }
  0xb7   :  { %v174_v40 = vmul.f32 %v173_v36, %v160_v28 }
  0xb8   :  { %v124_v41 = vadd.f32 0.0036580483, %v123_v37  ;;  %v135_v42 = vadd.f32 0.014752088, %v134_v38  ;;  %v164_v45 = vadd.f32 0.0036580483, %v163_v39 }
  0xb9   :  { %v175_v43 = vadd.f32 0.014752088, %v174_v40 }
  0xba   :  { %v136_v44 = vmul.f32 %v135_v42, %v120_v27  ;;  %v125_v47 = vmul.f32 %v124_v41, %v120_v27  ;;  %v165_v51 = vmul.f32 %v164_v45, %v160_v28 }
  0xbb   :  { %v176_v46 = vmul.f32 %v175_v43, %v160_v28 }
  0xbc   :  { %v137_v48 = vadd.f32 0.112945676, %v136_v44  ;;  %v126_v53 = vadd.f32 0.05243302, %v125_v47  ;;  %v166_v57 = vadd.f32 0.05243302, %v165_v51 }
  0xbd   :  { %v177_v49 = vadd.f32 0.112945676, %v176_v46 }
  0xbe   :  { %v138_v50 = vmul.f32 %v137_v48, %v120_v27  ;;  %v127_v59 = vmul.f32 %v126_v53, %v120_v27  ;;  %v167_v62 = vmul.f32 %v166_v57, %v160_v28 }
  0xbf   :  { %v178_v52 = vmul.f32 %v177_v49, %v160_v28 }
  0xc0   :  { %v139_v54 = vadd.f32 0.4994258, %v138_v50  ;;  %v128_v63 = vadd.f32 0.18741608, %v127_v59  ;;  %v168_v0 = vadd.f32 0.18741608, %v167_v62 }
  0xc1   :  { %v179_v55 = vadd.f32 0.4994258, %v178_v52 }
  0xc2   :  { %v140_v56 = vmul.f32 %v139_v54, %v120_v27  ;;  %v129_v2 = vmul.f32 %v128_v63, %v120_v27  ;;  %v169_v5 = vmul.f32 %v168_v0, %v160_v28 }
  0xc3   :  { %v180_v58 = vmul.f32 %v179_v55, %v160_v28 }
  0xc4   :  { %v141_v60 = vadd.f32 1.0, %v140_v56  ;;  %v130_v8 = vadd.f32 1.1283791, %v129_v2  ;;  %v170_v14 = vadd.f32 1.1283791, %v169_v5 }
  0xc5   :  { %v181_v61 = vadd.f32 1.0, %v180_v58 }
  0xc6   :  { %249 = vrcp.f32 %v141_v60  ;;  %v153_v9 = vand.u32 2147483648, %v141_v60  ;;  %v151_v12 = vand.u32 2147483647, %v141_v60  ;;  %vm147_vm2 = vweird.f32 %v141_v60 }
  0xc7   :  { %251 = vrcp.f32 %v181_v61  ;;  %v193_v13 = vand.u32 2147483648, %v181_v61  ;;  %v191_v16 = vand.u32 2147483647, %v181_v61  ;;  %vm187_vm4 = vweird.f32 %v181_v61 }
  0xc8   :  { %v154_v18 = vor.u32 1.1754944e-38, %v153_v9  ;;  %v131_v20 = vmul.f32 %v130_v8, %v376_v23  ;;  %vm152_vm5 = vcmp.eq.f32.partialorder %v151_v12, 8.507059e+37  ;;  %v171_v28 = vmul.f32 %v170_v14, %v379_v24 }
  0xc9   :  { %v194_v26 = vor.u32 1.1754944e-38, %v193_v13  ;;  %vm192_vm7 = vcmp.eq.f32.partialorder %v191_v16, 8.507059e+37  ;;  %v116_v23 = vmul.f32 0.5, %v373_v22 }
  0xcc   :  { %v250_v1 = vpop.eup %249 }
  0xcd   :  { %v252_v3 = vpop.eup %251  ;;  %v143_v4 = vmul.f32 %v250_v1, %v141_v60  ;;  %vm148_vm0 = vweird.f32 %v250_v1 }
  0xce   :  { %v183_v6 = vmul.f32 %v252_v3, %v181_v61  ;;  %vm188_vm1 = vweird.f32 %v252_v3  ;;  %vm149_vm3 = vmor %vm147_vm2, %vm148_vm0 }
  0xcf   :  { %v144_v7 = vsub.f32 1.0, %v143_v4  ;;  %vm189_vm6 = vmor %vm187_vm4, %vm188_vm1 }
  0xd0   :  { %v184_v10 = vsub.f32 1.0, %v183_v6 }
  0xd1   :  { %v145_v11 = vmul.f32 %v250_v1, %v144_v7 }
  0xd2   :  { %v185_v15 = vmul.f32 %v252_v3, %v184_v10 }
  0xd3   :  { %v146_v17 = vadd.f32 %v250_v1, %v145_v11 }
  0xd4   :  { %v186_v19 = vadd.f32 %v252_v3, %v185_v15 }
  0xd5   :  { %v150_v25 = vsel %vm149_vm3, %v250_v1, %v146_v17 }
  0xd6   :  { %v155_v27 = vsel %vm152_vm5, %v154_v18, %v150_v25  ;;  %v190_v29 = vsel %vm189_vm6, %v252_v3, %v186_v19 }
  0xd7   :  { %v156_v30 = vmul.f32 %v155_v27, %v131_v20  ;;  %v195_v31 = vsel %vm192_vm7, %v194_v26, %v190_v29 }
  0xd8   :  { %v196_v32 = vmul.f32 %v195_v31, %v171_v28 }
  0xd9   :  { %v225_v33 = vclamps-f32 %v156_v30, 1.0 }
  0xda   :  { %v226_v34 = vclamps-f32 %v196_v32, 1.0 }
  0xdb   :  { %v199_v36 = vadd.f32 1.0, %v225_v33 }
  0xdc   :  { %v200_v37 = vadd.f32 1.0, %v226_v34 }
  0xdd   :  { %v201_v24 = vmul.f32 %v199_v36, %v115_v35 }
  0xde   :  { %v202_v38 = vmul.f32 %v200_v37, %v116_v23 }
  0xdf   :  { %203 = vst [vmem:[#allocation7] sm:$0xff] %v201_v24 }
  0xe0   :  { %204 = vst [vmem:[#allocation7 + $0x8] sm:$0xff] %v202_v38 }
  0xe1   :  { %217 = dma.vmem_to_hbm [thread:$0]  %s210_s24, 256, %s212_s27, [#allocation4], %s332_s20, %s332_s20, %s333_s21  }
  0xe2   :  { %329 = dma.done.wait [#allocation4], 256  }
  0xe3   :  { %330 = vsyncadd [#allocation4], 4294967040 }
  0xe4   :  { %222 = vsyncpa [#allocation3], 1 }
  0xe5   :  { %223 = vsyncpa [#allocation6], 1 }
  0xe6   :  { %224 = vsyncpa [#allocation4], 1 }

</bundles_post_ra>
